<compile_context>
chip_gen: v5e
topology: v5e:2x2
jax: 0.10.0
libtpu: 0.0.40
codegen_flags: <defaults>
</compile_context>

<pallas_src>
import jax
import jax.numpy as jnp
from jax.experimental import pallas as pl
from jax.experimental.pallas import tpu as pltpu

_LANES = 128            # vreg lane width
_SUBLANES = 8           # f32 sublane height
_MAX_BLOCK_ROWS = 2048  # 2048 * 128 * 4 B = 1 MiB per block per buffer:
                        # with double-buffered in+out that is ~4 MiB resident,
                        # comfortably inside v5e/v6e/v7x scoped VMEM defaults.


def _identity_kernel(x_ref, o_ref):
    # Pure pass-through of one (block_rows, 128) lane-dense tile.
    o_ref[...] = x_ref[...]


def _pick_block_rows(rows: int) -> int:
    """Largest (8,128)-friendly row block that evenly divides `rows`."""
    if rows <= _MAX_BLOCK_ROWS:
        # Full extent is always a legal block shape.
        return rows
    # Largest multiple-of-8 divisor of `rows` not exceeding the cap.
    for br in range(_MAX_BLOCK_ROWS, _SUBLANES - 1, -_SUBLANES):
        if rows % br == 0:
            return br
    return rows  # no aligned divisor found: fall back to one big block


def norm2corr_forward(normal_map: jax.Array) -> jax.Array:
    """Pallas-backed forward for Norm2Corr.

    The reference module has no layers and an empty forward; this runs an
    aliased identity copy of the NCHW normal map through a Pallas TPU kernel.
    """
    B, C, H, W = normal_map.shape
    total = B * C * H * W

    # Flatten NCHW to a lane-dense 2-D slab (last dim a multiple of 128) so
    # every store is a full, unmasked 128-lane vst.
    if total % _LANES == 0:
        rows, cols = total // _LANES, _LANES
    else:
        rows, cols = B * C * H, W  # fallback (partial stores; small inputs only)
    x2d = normal_map.reshape(rows, cols)

    block_rows = _pick_block_rows(rows)
    grid = (rows // block_rows,)

    out2d = pl.pallas_call(
        _identity_kernel,
        out_shape=jax.ShapeDtypeStruct((rows, cols), normal_map.dtype),
        grid=grid,
        in_specs=[pl.BlockSpec((block_rows, cols), lambda i: (i, 0))],
        out_specs=pl.BlockSpec((block_rows, cols), lambda i: (i, 0)),
        # Output aliases the input buffer: no extra HBM allocation for the
        # no-op forward; the "copy" is at most an in-place writeback.
        input_output_aliases={0: 0},
        compiler_params=pltpu.CompilerParams(
            # Shards row blocks across v7x's two TensorCores; measured
            # near-zero effect on single-TC v5e/v6e.
            dimension_semantics=("parallel",),
        ),
    )(x2d)

    return out2d.reshape(B, C, H, W)


if __name__ == "__main__":
    key = jax.random.PRNGKey(0)
    # Small NCHW normal map: batch=2, channels=3 (nx, ny, nz), spatial=16.
    B, C, H, W = 2, 3, 16, 16
    normal_map = jax.random.normal(key, (B, C, H, W), dtype=jnp.float32)
    # Normalize to unit normals (input prep, plain JAX glue — not part of the
    # reference forward, just makes the example input a valid normal map).
    normal_map = normal_map / jnp.linalg.norm(normal_map, axis=1, keepdims=True)

    fwd = jax.jit(norm2corr_forward)
    out = fwd(normal_map)
    out = jax.block_until_ready(out)

    # Sanity: identity pass-through must match the input exactly.
    assert out.shape == normal_map.shape
    assert jnp.allclose(out, normal_map)
    print("KERNEL_OK")
</pallas_src>

<mosaic_0001>
module attributes {stable_mosaic.version = 11 : i64} {
  func.func @_identity_kernel(%arg0: i32, %arg1: memref<12x128xf32, #tpu.memory_space<vmem>>, %arg2: memref<12x128xf32, #tpu.memory_space<vmem>>) attributes {dimension_semantics = [#tpu.dimension_semantics<parallel>], iteration_bounds = array<i64: 1>, scalar_prefetch = 0 : i64, scratch_operands = 0 : i64, tpu.core_type = #tpu.core_type<tc>, window_params = [{transform_indices = @transform_0, window_bounds = array<i64: 12, 128>}, {transform_indices = @transform_1, window_bounds = array<i64: 12, 128>}]} {
    %c0 = arith.constant 0 : index
    %c0_0 = arith.constant 0 : index
    %0 = vector.load %arg1[%c0, %c0_0] : memref<12x128xf32, #tpu.memory_space<vmem>>, vector<12x128xf32>
    %c0_1 = arith.constant 0 : index
    %c0_2 = arith.constant 0 : index
    %1 = vector.load %arg2[%c0_1, %c0_2] : memref<12x128xf32, #tpu.memory_space<vmem>>, vector<12x128xf32>
    tpu.vector_store %arg2[%c0_1, %c0_2], %0 {strides = array<i32>} : memref<12x128xf32, #tpu.memory_space<vmem>>, vector<12x128xf32>,
    return
  }
  func.func @transform_0(%arg0: i32) -> (i32, i32) {
    %c0_i32 = arith.constant 0 : i32
    %c0_i32_0 = arith.constant 0 : i32
    return %arg0, %c0_i32 : i32, i32
  }
  func.func @transform_1(%arg0: i32) -> (i32, i32) {
    %c0_i32 = arith.constant 0 : i32
    %c0_i32_0 = arith.constant 0 : i32
    return %arg0, %c0_i32 : i32, i32
  }
}

</mosaic_0001>

<bundles_post_ra>
// kernel: norm2corr_forward.1
= control target key start
LH: loop header
LB: loop body
LE: loop exit
PB: predicated region body
PF: predicated region fallthrough
CT: control target
= control target key end

     0   :  { %s38_s0 = inlined_call_operand.vmem [shape: f32[12,128], index: 0, kind: input, shape index: {}, may-alias: {0,1}]   ;;  %s39_s1 = inlined_call_operand.vmem [shape: f32[12,128], index: 1, kind: output, shape index: {}, may-alias: {0,1}]  }
   0x1   :  { %v8_v0 = vld [vmem:[%s38_s0] sm:$0xff]  ;;  %v9_v1 = vld [vmem:[%s38_s0 + $0x8] sm:$0xf] }
   0x2   :  { %10 = vst [vmem:[%s39_s1] sm:$0xff] %v8_v0 }
   0x3   :  { %11 = vst [vmem:[%s39_s1 + $0x8] sm:$0xf] %v9_v1 }

</bundles_post_ra>
